<compile_context>
chip_gen: v7x
topology: tpu7x:2x2x1
jax: 0.10.0
libtpu: 0.0.40
codegen_flags: <defaults>
</compile_context>

<pallas_src>
from functools import partial

import numpy as np
import jax
import jax.numpy as jnp
from jax.experimental import pallas as pl
from jax.experimental.pallas import tpu as pltpu


# ---------------------------------------------------------------------------
# Pallas kernel: per-row masked select.
#   out[i, j] = embeds[i, j] if keep[i, j] != 0 else mask_token[0, j]
# ---------------------------------------------------------------------------
def _mask_blend_kernel(embeds_ref, keep_ref, token_ref, out_ref):
    keep = keep_ref[...] != 0                                   # (TB, E) bool
    token = jnp.broadcast_to(token_ref[...], keep.shape)        # (TB, E)
    out_ref[...] = jnp.where(keep, embeds_ref[...], token)


# ---------------------------------------------------------------------------
# Tiling / VMEM sizing helpers (host-side, trace-time only).
# ---------------------------------------------------------------------------
def _vmem_capacity_bytes():
    try:
        return int(pltpu.get_tpu_info().vmem_capacity_bytes)
    except Exception:
        return 64 * 1024 * 1024          # conservative fallback (v7x per-TC VMEM)


def _pick_row_tile(batch, emb, dtype):
    """Rows per grid step.

    * multiple of 32 (int8 mask sublane packing; also covers f32/bf16),
    * double-buffered footprint <= ~VMEM/4 (16 MiB on v7x, 32 MiB on v5e/v6e,
      never above 48 MiB),
    * >= 4 grid steps when the batch allows (>= 2 per v7x TensorCore and
      >= 2 in flight per core for DMA pipelining).
    """
    gran = 32
    itemsize = jnp.dtype(dtype).itemsize
    bytes_per_row = emb * (2 * itemsize + 1)          # embeds in + out + int8 mask
    budget = min(_vmem_capacity_bytes() // 4, 48 * 1024 * 1024)
    tb_max = max(gran, (budget // (2 * bytes_per_row)) // gran * gran)
    b_up = -(-batch // gran) * gran                   # batch rounded up to gran
    tb_max = min(tb_max, b_up)
    n_steps = -(-b_up // tb_max)
    if n_steps < 4 and b_up >= 4 * gran:
        n_steps = 4                                   # feed both v7x TCs + pipeline
    rows = -(-b_up // n_steps)
    tb = -(-rows // gran) * gran                      # <= tb_max (budget respected)
    return tb


def _vmem_limit_bytes(tb, emb, dtype):
    itemsize = jnp.dtype(dtype).itemsize
    per_step = tb * emb * (2 * itemsize + 1)          # embeds + out + int8 mask tile
    token = emb * itemsize
    return int(2 * (per_step + token) + (8 << 20))    # double buffers + margin


# ---------------------------------------------------------------------------
# pallas_call wrapper.
# ---------------------------------------------------------------------------
def _mask_blend(embeds, keep_mask, mask_token, *, tb):
    """embeds (Bp,E) native dtype, keep_mask (Bp,E) int8, mask_token (1,E)."""
    Bp, E = embeds.shape
    assert Bp % tb == 0
    return pl.pallas_call(
        _mask_blend_kernel,
        out_shape=jax.ShapeDtypeStruct((Bp, E), embeds.dtype),
        grid_spec=pltpu.PrefetchScalarGridSpec(
            num_scalar_prefetch=0,
            grid=(Bp // tb,),
            in_specs=[
                pl.BlockSpec((tb, E), lambda i: (i, 0)),   # embeds
                pl.BlockSpec((tb, E), lambda i: (i, 0)),   # int8 keep-mask
                pl.BlockSpec((1, E), lambda i: (0, 0)),    # mask token (resident)
            ],
            out_specs=pl.BlockSpec((tb, E), lambda i: (i, 0)),
        ),
        # embeds -> out: drops a B*E*itemsize HBM allocation; with the caller
        # donating embeds at its jit boundary this becomes a true in-place op.
        input_output_aliases={0: 0},
        compiler_params=pltpu.CompilerParams(
            dimension_semantics=("parallel",),               # shard grid on v7x TCs
            vmem_limit_bytes=_vmem_limit_bytes(tb, E, embeds.dtype),
        ),
    )(embeds, keep_mask, mask_token)


# ---------------------------------------------------------------------------
# Device forward path (jitted): mask generation + Pallas blend.
# ---------------------------------------------------------------------------
@partial(jax.jit, static_argnames=("base_mask_ratio",))
def _forward_device(embeds, dynamic_factors, rng_key, mask_token, *, base_mask_ratio):
    B, E = embeds.shape
    ratio = base_mask_ratio * dynamic_factors.astype(jnp.float32)            # (B,)
    # Reference: max(int(E * ratio), 1).  Computed in f32 (can differ by 1 from
    # the reference's float64 int() only when E*ratio lands exactly on an
    # integer).  Clamped to E (the reference's np.random.choice would raise).
    num_masked = jnp.clip(jnp.floor(E * ratio).astype(jnp.int32), 1, E)      # (B,)

    # Uniform subset without replacement, one batched path (no vmapped
    # per-row permutation, no key splitting): rank each row's uniforms via an
    # inverse permutation; element j of row i is masked iff rank < num_masked.
    # The int32 ranks stay a fused intermediate; only the 1-byte keep mask
    # reaches HBM before the Pallas kernel reads it.
    u = jax.random.uniform(rng_key, (B, E), dtype=jnp.float32)
    order = jnp.argsort(u, axis=-1)
    ranks = jnp.argsort(order, axis=-1)              # exact inverse perm (tie-free)
    keep_mask = (ranks >= num_masked[:, None]).astype(jnp.int8)              # 1=keep

    tb = _pick_row_tile(B, E, embeds.dtype)
    Bp = -(-B // tb) * tb
    if Bp != B:
        embeds_p = jnp.pad(embeds, ((0, Bp - B), (0, 0)))
        keep_p = jnp.pad(keep_mask, ((0, Bp - B), (0, 0)), constant_values=1)
    else:
        embeds_p, keep_p = embeds, keep_mask

    token = mask_token.astype(embeds.dtype)
    out = _mask_blend(embeds_p, keep_p, token, tb=tb)
    masked = out[:B] if Bp != B else out
    return masked, keep_mask


# ---------------------------------------------------------------------------
# Module wrapper (parameter init + ragged seed-list glue).
# ---------------------------------------------------------------------------
class DynamicNodeMaskPallas:
    def __init__(self, base_mask_ratio, embedding_size):
        self.base_mask_ratio = float(base_mask_ratio)
        self.embedding_size = int(embedding_size)
        # nn.Parameter(torch.zeros(1, embedding_size)) -> deterministic zeros init.
        self.mask_token = jnp.zeros((1, embedding_size), dtype=jnp.float32)

    def forward(self, embeds, dynamic_factors, rng_key, return_seeds=True):
        B, E = embeds.shape
        assert E == self.embedding_size
        masked_embeds, keep_mask = _forward_device(
            embeds, dynamic_factors, rng_key, self.mask_token,
            base_mask_ratio=self.base_mask_ratio)

        # Ragged list of per-row masked indices, like the PyTorch module.
        # One (B, E) int8 device->host fetch, seeds kept as host NumPy arrays
        # (no per-row host->device transfers).
        # TODO(synk): NumPy's np.random.choice stream is not bit-reproducible
        #             here; subsets are still uniform without replacement.
        all_seeds = None
        if return_seeds:
            keep_h = np.asarray(jax.device_get(keep_mask))
            all_seeds = [np.nonzero(keep_h[i] == 0)[0].astype(np.int32)
                         for i in range(B)]
        return masked_embeds, all_seeds


# ---------------------------------------------------------------------------
if __name__ == "__main__":
    B, E = 8, 128
    base_mask_ratio = 0.3

    key = jax.random.PRNGKey(0)
    k_emb, k_fac, k_perm = jax.random.split(key, 3)

    embeds = jax.random.normal(k_emb, (B, E), dtype=jnp.float32)
    # Positive per-sample dynamic factors in ~[0.5, 1.5).
    dynamic_factors = 0.5 + jax.random.uniform(k_fac, (B,), dtype=jnp.float32)

    emb_h = np.asarray(embeds)                    # host copy before forward
    fac_h = np.asarray(dynamic_factors)

    module = DynamicNodeMaskPallas(base_mask_ratio, E)
    masked_embeds, all_seeds = module.forward(embeds, dynamic_factors, k_perm)
    masked_embeds = jax.block_until_ready(masked_embeds)

    # Self-check against the reference semantics.
    assert masked_embeds.shape == (B, E)
    assert masked_embeds.dtype == embeds.dtype
    tok_h = np.zeros((E,), dtype=np.float32)      # mask token is zero-initialized
    ref = emb_h.copy()
    for i in range(B):
        seeds = np.asarray(all_seeds[i])
        # Same f32 arithmetic as the device path.
        exp_n = max(int(np.floor(np.float32(E) *
                                 (np.float32(base_mask_ratio) * fac_h[i]))), 1)
        exp_n = min(exp_n, E)
        assert 1 <= seeds.shape[0] <= E
        assert seeds.shape[0] == exp_n, (seeds.shape[0], exp_n)
        mask = np.ones((E,), dtype=np.float32)
        mask[seeds] = 0.0
        ref[i] = emb_h[i] * mask + tok_h * (1.0 - mask)
    np.testing.assert_allclose(np.asarray(masked_embeds), ref, rtol=1e-6, atol=1e-6)

    print("KERNEL_OK")
</pallas_src>

<mosaic_0001>
module attributes {stable_mosaic.version = 11 : i64} {
  func.func @_mask_blend_kernel(%arg0: i32, %arg1: memref<32x128xf32, #tpu.memory_space<vmem>>, %arg2: memref<32x128xi8, #tpu.memory_space<vmem>>, %arg3: memref<1x128xf32, #tpu.memory_space<vmem>>, %arg4: memref<32x128xf32, #tpu.memory_space<vmem>>) attributes {dimension_semantics = [#tpu.dimension_semantics<parallel>], iteration_bounds = array<i64: 1>, scalar_prefetch = 0 : i64, scratch_operands = 0 : i64, tpu.core_type = #tpu.core_type<tc>, window_params = [{transform_indices = @transform_0, window_bounds = array<i64: 32, 128>}, {transform_indices = @transform_1, window_bounds = array<i64: 32, 128>}, {pipeline_mode = #tpu.pipeline_mode<synchronous>, transform_indices = @transform_2, window_bounds = array<i64: 1, 128>}, {transform_indices = @transform_3, window_bounds = array<i64: 32, 128>}]} {
    %c0 = arith.constant 0 : index
    %c0_0 = arith.constant 0 : index
    %0 = vector.load %arg2[%c0, %c0_0] : memref<32x128xi8, #tpu.memory_space<vmem>>, vector<32x128xi8>
    %c0_i8 = arith.constant 0 : i8
    %1 = vector.broadcast %c0_i8 : i8 to vector<32x128xi8>
    %2 = arith.cmpi ne, %0, %1 : vector<32x128xi8>
    %c0_1 = arith.constant 0 : index
    %c0_2 = arith.constant 0 : index
    %3 = vector.load %arg3[%c0_1, %c0_2] : memref<1x128xf32, #tpu.memory_space<vmem>>, vector<1x128xf32>
    %4 = vector.shape_cast %3 : vector<1x128xf32> to vector<1x128xf32>
    %5 = vector.broadcast %4 : vector<1x128xf32> to vector<32x128xf32>
    %c0_3 = arith.constant 0 : index
    %c0_4 = arith.constant 0 : index
    %6 = vector.load %arg1[%c0_3, %c0_4] : memref<32x128xf32, #tpu.memory_space<vmem>>, vector<32x128xf32>
    %7 = arith.select %2, %6, %5 : vector<32x128xi1>, vector<32x128xf32>
    %c0_5 = arith.constant 0 : index
    %c0_6 = arith.constant 0 : index
    %8 = vector.load %arg4[%c0_5, %c0_6] : memref<32x128xf32, #tpu.memory_space<vmem>>, vector<32x128xf32>
    tpu.vector_store %arg4[%c0_5, %c0_6], %7 {strides = array<i32>} : memref<32x128xf32, #tpu.memory_space<vmem>>, vector<32x128xf32>,
    return
  }
  func.func @transform_0(%arg0: i32) -> (i32, i32) {
    %c0_i32 = arith.constant 0 : i32
    %c0_i32_0 = arith.constant 0 : i32
    return %arg0, %c0_i32 : i32, i32
  }
  func.func @transform_1(%arg0: i32) -> (i32, i32) {
    %c0_i32 = arith.constant 0 : i32
    %c0_i32_0 = arith.constant 0 : i32
    return %arg0, %c0_i32 : i32, i32
  }
  func.func @transform_2(%arg0: i32) -> (i32, i32) {
    %c0_i32 = arith.constant 0 : i32
    %c0_i32_0 = arith.constant 0 : i32
    %c0_i32_1 = arith.constant 0 : i32
    return %c0_i32, %c0_i32_0 : i32, i32
  }
  func.func @transform_3(%arg0: i32) -> (i32, i32) {
    %c0_i32 = arith.constant 0 : i32
    %c0_i32_0 = arith.constant 0 : i32
    return %arg0, %c0_i32 : i32, i32
  }
}

</mosaic_0001>

<bundles_post_ra>
// kernel: _forward_device.1
= control target key start
LH: loop header
LB: loop body
LE: loop exit
PB: predicated region body
PF: predicated region fallthrough
CT: control target
= control target key end

     0   :  { %v72_v1 = vmov 0   ;;  %s123_s1 = inlined_call_operand.vmem [shape: s8[32,128], index: 1, kind: input, shape index: {}]   ;;  %s124_s2 = inlined_call_operand.vmem [shape: f32[1,128], index: 2, kind: input, shape index: {}]   ;;  %s125_s0 = inlined_call_operand.vmem [shape: f32[32,128], index: 0, kind: input, shape index: {}, may-alias: {0,3}]   ;;  %s126_s3 = inlined_call_operand.vmem [shape: f32[32,128], index: 3, kind: output, shape index: {}, may-alias: {0,3}]  }
   0x1   :  { %v16_v0 = vld [vmem:[%s123_s1] sm:$0xff]  ;;  %v26_v21 = vld [vmem:[%s125_s0 + $0x8] sm:$0xff]  ;;  %v27_v23 = vld [vmem:[%s125_s0 + $0x10] sm:$0xff] }
   0x2   :  { %vm17_vm0 = vnez %v16_v0  ;;  %v70_v15 = vld [vmem:[%s124_s2] ss:$0 sm:$0xff]  ;;  %v28_v26 = vld [vmem:[%s125_s0 + $0x18] sm:$0xff] }
   0x3   :  { %v29_v2 = vsel %vm17_vm0, 16843009, %v72_v1  ;;  %v25_v19 = vld [vmem:[%s125_s0] sm:$0xff] }
   0x4   :  { %v30_v3 = vunpack.c.0.s8 %v29_v2  ;;  %v31_v4 = vunpack.c.1.s8 %v29_v2  ;;  %v32_v5 = vunpack.c.2.s8 %v29_v2  ;;  %v33_v6 = vunpack.c.3.s8 %v29_v2 }
   0x6   :  { %v34_v7 = vpack.c.b16 %v30_v3, %v30_v3  ;;  %v36_v8 = vpack.c.b16 %v31_v4, %v31_v4  ;;  %v38_v9 = vpack.c.b16 %v32_v5, %v32_v5  ;;  %v40_v10 = vpack.c.b16 %v33_v6, %v33_v6 }
   0x8   :  { %v35_v11 = vpack.c.b8 %v34_v7, %v34_v7  ;;  %v37_v12 = vpack.c.b8 %v36_v8, %v36_v8  ;;  %v39_v13 = vpack.c.b8 %v38_v9, %v38_v9  ;;  %v41_v14 = vpack.c.b8 %v40_v10, %v40_v10 }
   0xa   :  { %vm42_vm1 = vnez %v35_v11  ;;  %vm43_vm2 = vnez %v37_v12  ;;  %vm44_vm3 = vnez %v39_v13  ;;  %vm45_vm4 = vnez %v41_v14 }
   0xb   :  { %v46_v16 = vsel %vm42_vm1, 16843009, %v72_v1  ;;  %v47_v17 = vsel %vm43_vm2, 16843009, %v72_v1  ;;  %v48_v18 = vsel %vm44_vm3, 16843009, %v72_v1 }
   0xc   :  { %v50_v20 = vunpack.c.0.s8 %v46_v16  ;;  %v51_v22 = vunpack.c.0.s8 %v47_v17  ;;  %v52_v24 = vunpack.c.0.s8 %v48_v18  ;;  %v49_v25 = vsel %vm45_vm4, 16843009, %v72_v1 }
   0xd   :  { %v53_v27 = vunpack.c.0.s8 %v49_v25 }
   0xe   :  { %vm54_vm5 = vcmp.ne.s32.totalorder %v50_v20, 0  ;;  %vm55_vm6 = vcmp.ne.s32.totalorder %v51_v22, 0  ;;  %vm56_vm7 = vcmp.ne.s32.totalorder %v52_v24, 0 }
   0xf   :  { %v58_v28 = vsel %vm54_vm5, %v25_v19, %v70_v15  ;;  %v59_v29 = vsel %vm55_vm6, %v26_v21, %v70_v15  ;;  %v60_v30 = vsel %vm56_vm7, %v27_v23, %v70_v15  ;;  %vm57_vm8 = vcmp.ne.s32.totalorder %v53_v27, 0 }
  0x10   :  { %62 = vst [vmem:[%s126_s3] sm:$0xff] %v58_v28  ;;  %63 = vst [vmem:[%s126_s3 + $0x8] sm:$0xff] %v59_v29  ;;  %v61_v31 = vsel %vm57_vm8, %v28_v26, %v70_v15 }
  0x11   :  { %64 = vst [vmem:[%s126_s3 + $0x10] sm:$0xff] %v60_v30  ;;  %65 = vst [vmem:[%s126_s3 + $0x18] sm:$0xff] %v61_v31 }

</bundles_post_ra>
